<compile_context>
chip_gen: v7x
topology: tpu7x:2x2x1
jax: 0.10.0
libtpu: 0.0.40
codegen_flags: <defaults>
</compile_context>

<pallas_src>
import jax
import jax.numpy as jnp
from jax.experimental import pallas as pl
from jax.experimental.pallas import tpu as pltpu


# ---------------------------------------------------------------------------
# Model hyper-parameters (a small "nc" config)
# ---------------------------------------------------------------------------
Z_LEN = 8            # nc.z_len
EMBED_DIM = 32       # nc.embed_dim
HEAD_DIM = 12        # decoder output dim (fixed to 12 in the module)
MAIN_ACT = "relu"    # nc.main_activation_func

LANE = 128                         # lane-dense padded feature width
K_TOTAL = Z_LEN + LANE + LANE      # rows of the fused weight slab (8+128+128)

BATCH = 64                         # demo batch


def _act(x):
    if MAIN_ACT == "relu":
        return jnp.maximum(x, 0.0)
    return jnp.tanh(x)


# ---------------------------------------------------------------------------
# Pallas kernel: 3 fused-lane matmuls + activations on one batch tile
# ---------------------------------------------------------------------------
def decoder_kernel(x_ref, w_ref, b_ref, out_ref):
    x = x_ref[...]                                   # (tile_b, Z_LEN)

    # Static slices of the fused weight/bias slabs (zero runtime cost).
    w1 = w_ref[pl.ds(0, Z_LEN), :]                   # (Z_LEN, 128)
    w2 = w_ref[pl.ds(Z_LEN, LANE), :]                # (128, 128), zero-padded
    w3 = w_ref[pl.ds(Z_LEN + LANE, LANE), :]         # (128, 128), zero-padded
    b1 = b_ref[pl.ds(0, 1), :]                       # (1, 128)
    b2 = b_ref[pl.ds(1, 1), :]
    b3 = b_ref[pl.ds(2, 1), :]

    h = _act(jnp.dot(x, w1, preferred_element_type=jnp.float32) + b1)
    h = _act(jnp.dot(h, w2, preferred_element_type=jnp.float32) + b2)
    y = jnp.dot(h, w3, preferred_element_type=jnp.float32) + b3   # (tile_b, 128)

    # Only the first 12 lanes are real; store them directly (masked vst) so
    # the wrapper needs no post-kernel column slice / extra dispatch.
    out_ref[...] = y[:, :HEAD_DIM]


# ---------------------------------------------------------------------------
# Wrapper
# ---------------------------------------------------------------------------
def _tiling_for_batch(b):
    """At most 2 parallel grid steps; each tile sublane-aligned (multiple of 8)."""
    num_steps = 2 if b >= 16 else 1
    tile_b = -(-b // num_steps)                 # cdiv
    tile_b = ((tile_b + 7) // 8) * 8            # sublane alignment
    return num_steps, tile_b


@jax.jit
def decoder_forward(x, w_slab, b_slab):
    b = x.shape[0]
    num_steps, tile_b = _tiling_for_batch(b)
    b_pad = num_steps * tile_b
    if b_pad != b:
        # Padded rows produce garbage we slice off below; weights untouched.
        x = jnp.pad(x, ((0, b_pad - b), (0, 0)))

    out = pl.pallas_call(
        decoder_kernel,
        out_shape=jax.ShapeDtypeStruct((b_pad, HEAD_DIM), jnp.float32),
        grid_spec=pltpu.PrefetchScalarGridSpec(
            num_scalar_prefetch=0,
            grid=(num_steps,),
            in_specs=[
                # x tile (last dim == full array dim -> legal block).
                pl.BlockSpec((tile_b, Z_LEN), lambda i: (i, 0)),
                # Resident fused weight slab: constant index, single buffer.
                pl.BlockSpec((K_TOTAL, LANE), lambda i: (0, 0),
                             pipeline_mode=pl.Buffered(1)),
                # Resident fused bias slab.
                pl.BlockSpec((8, LANE), lambda i: (0, 0),
                             pipeline_mode=pl.Buffered(1)),
            ],
            out_specs=pl.BlockSpec((tile_b, HEAD_DIM), lambda i: (i, 0)),
        ),
        compiler_params=pltpu.CompilerParams(
            dimension_semantics=("parallel",)),   # 2 steps -> one per v7x TC
    )(x, w_slab, b_slab)

    if b_pad != b:
        out = out[:b]
    return out


# ---------------------------------------------------------------------------
# Deterministic parameter init (PyTorch nn.Linear-style uniform) + slab packing
# ---------------------------------------------------------------------------
def init_params(key):
    def lin(k, fan_in, fan_out):
        kw, kb = jax.random.split(k)
        bound = 1.0 / jnp.sqrt(float(fan_in))
        w = jax.random.uniform(kw, (fan_in, fan_out), jnp.float32, -bound, bound)
        bvec = jax.random.uniform(kb, (fan_out,), jnp.float32, -bound, bound)
        return w, bvec

    k1, k2, k3 = jax.random.split(key, 3)
    w1, b1 = lin(k1, Z_LEN, EMBED_DIM)       # fc1: z_len -> embed_dim
    w2, b2 = lin(k2, EMBED_DIM, EMBED_DIM)   # fc2: embed_dim -> embed_dim
    w3, b3 = lin(k3, EMBED_DIM, HEAD_DIM)    # fc3: embed_dim -> 12
    return w1, b1, w2, b2, w3, b3


def pack_params(params):
    """Pad every layer to 128 lanes and fuse into one weight + one bias slab."""
    w1, b1, w2, b2, w3, b3 = params
    w1p = jnp.zeros((Z_LEN, LANE), jnp.float32).at[:, :EMBED_DIM].set(w1)
    w2p = jnp.zeros((LANE, LANE), jnp.float32).at[:EMBED_DIM, :EMBED_DIM].set(w2)
    w3p = jnp.zeros((LANE, LANE), jnp.float32).at[:EMBED_DIM, :HEAD_DIM].set(w3)
    w_slab = jnp.concatenate([w1p, w2p, w3p], axis=0)          # (264, 128)
    b_slab = (jnp.zeros((8, LANE), jnp.float32)
              .at[0, :EMBED_DIM].set(b1)
              .at[1, :EMBED_DIM].set(b2)
              .at[2, :HEAD_DIM].set(b3))                       # (8, 128)
    return w_slab, b_slab


# ---------------------------------------------------------------------------
# Pure-JAX reference (same math, unpadded) for a sanity check
# ---------------------------------------------------------------------------
def reference_forward(x, params):
    w1, b1, w2, b2, w3, b3 = params
    h = _act(x @ w1 + b1)
    h = _act(h @ w2 + b2)
    return h @ w3 + b3


if __name__ == "__main__":
    key = jax.random.PRNGKey(0)
    k_x, k_params = jax.random.split(key)

    x = jax.random.normal(k_x, (BATCH, Z_LEN), jnp.float32)
    params = init_params(k_params)
    w_slab, b_slab = pack_params(params)

    out = decoder_forward(x, w_slab, b_slab)
    jax.block_until_ready(out)

    # correctness vs pure-JAX reference
    ref = reference_forward(x, params)
    assert out.shape == (BATCH, HEAD_DIM)
    assert jnp.allclose(out, ref, atol=1e-4, rtol=1e-4), "decoder output mismatch"

    print("KERNEL_OK")
</pallas_src>

<mosaic_0001>
module attributes {stable_mosaic.version = 11 : i64} {
  func.func @decoder_kernel(%arg0: i32, %arg1: memref<32x8xf32, #tpu.memory_space<vmem>>, %arg2: memref<264x128xf32, #tpu.memory_space<vmem>>, %arg3: memref<8x128xf32, #tpu.memory_space<vmem>>, %arg4: memref<32x12xf32, #tpu.memory_space<vmem>>) attributes {dimension_semantics = [#tpu.dimension_semantics<parallel>], iteration_bounds = array<i64: 2>, scalar_prefetch = 0 : i64, scratch_operands = 0 : i64, tpu.core_type = #tpu.core_type<tc>, window_params = [{transform_indices = @transform_0, window_bounds = array<i64: 32, 8>}, {pipeline_mode = #tpu.pipeline_mode<synchronous>, transform_indices = @transform_1, window_bounds = array<i64: 264, 128>}, {pipeline_mode = #tpu.pipeline_mode<synchronous>, transform_indices = @transform_2, window_bounds = array<i64: 8, 128>}, {transform_indices = @transform_3, window_bounds = array<i64: 32, 12>}]} {
    %c0 = arith.constant 0 : index
    %c0_0 = arith.constant 0 : index
    %0 = vector.load %arg1[%c0, %c0_0] : memref<32x8xf32, #tpu.memory_space<vmem>>, vector<32x8xf32>
    %c0_1 = arith.constant 0 : index
    %c0_2 = arith.constant 0 : index
    %1 = vector.load %arg2[%c0_1, %c0_2] : memref<264x128xf32, #tpu.memory_space<vmem>>, vector<8x128xf32>
    %c8 = arith.constant 8 : index
    %c0_3 = arith.constant 0 : index
    %2 = vector.load %arg2[%c8, %c0_3] : memref<264x128xf32, #tpu.memory_space<vmem>>, vector<128x128xf32>
    %c136 = arith.constant 136 : index
    %c0_4 = arith.constant 0 : index
    %3 = vector.load %arg2[%c136, %c0_4] : memref<264x128xf32, #tpu.memory_space<vmem>>, vector<128x128xf32>
    %c0_5 = arith.constant 0 : index
    %c0_6 = arith.constant 0 : index
    %4 = vector.load %arg3[%c0_5, %c0_6] : memref<8x128xf32, #tpu.memory_space<vmem>>, vector<1x128xf32>
    %c1 = arith.constant 1 : index
    %c0_7 = arith.constant 0 : index
    %5 = vector.load %arg3[%c1, %c0_7] : memref<8x128xf32, #tpu.memory_space<vmem>>, vector<1x128xf32>
    %c2 = arith.constant 2 : index
    %c0_8 = arith.constant 0 : index
    %6 = vector.load %arg3[%c2, %c0_8] : memref<8x128xf32, #tpu.memory_space<vmem>>, vector<1x128xf32>
    %cst = arith.constant dense<0.000000e+00> : vector<32x128xf32>
    %7 = tpu.matmul %0, %1, %cst {dimension_numbers = #tpu.dot_dimension_numbers<[1], [0], [0], [1], [0, 0, 1, 1], [], []>} : vector<32x8xf32>, vector<8x128xf32>, vector<32x128xf32> -> vector<32x128xf32>
    %8 = vector.broadcast %4 : vector<1x128xf32> to vector<32x128xf32>
    %9 = arith.addf %7, %8 : vector<32x128xf32>
    %cst_9 = arith.constant 0.000000e+00 : f32
    %10 = vector.broadcast %cst_9 : f32 to vector<32x128xf32>
    %11 = arith.maximumf %9, %10 : vector<32x128xf32>
    %cst_10 = arith.constant dense<0.000000e+00> : vector<32x128xf32>
    %12 = tpu.matmul %11, %2, %cst_10 {dimension_numbers = #tpu.dot_dimension_numbers<[1], [0], [0], [1], [0, 0, 1, 1], [], []>} : vector<32x128xf32>, vector<128x128xf32>, vector<32x128xf32> -> vector<32x128xf32>
    %13 = vector.broadcast %5 : vector<1x128xf32> to vector<32x128xf32>
    %14 = arith.addf %12, %13 : vector<32x128xf32>
    %cst_11 = arith.constant 0.000000e+00 : f32
    %15 = vector.broadcast %cst_11 : f32 to vector<32x128xf32>
    %16 = arith.maximumf %14, %15 : vector<32x128xf32>
    %cst_12 = arith.constant dense<0.000000e+00> : vector<32x128xf32>
    %17 = tpu.matmul %16, %3, %cst_12 {dimension_numbers = #tpu.dot_dimension_numbers<[1], [0], [0], [1], [0, 0, 1, 1], [], []>} : vector<32x128xf32>, vector<128x128xf32>, vector<32x128xf32> -> vector<32x128xf32>
    %18 = vector.broadcast %6 : vector<1x128xf32> to vector<32x128xf32>
    %19 = arith.addf %17, %18 : vector<32x128xf32>
    %20 = vector.extract_strided_slice %19 {offsets = [0, 0], sizes = [32, 12], strides = [1, 1]} : vector<32x128xf32> to vector<32x12xf32>
    %c0_13 = arith.constant 0 : index
    %c0_14 = arith.constant 0 : index
    %21 = vector.load %arg4[%c0_13, %c0_14] : memref<32x12xf32, #tpu.memory_space<vmem>>, vector<32x12xf32>
    tpu.vector_store %arg4[%c0_13, %c0_14], %20 {strides = array<i32>} : memref<32x12xf32, #tpu.memory_space<vmem>>, vector<32x12xf32>,
    return
  }
  func.func @transform_0(%arg0: i32) -> (i32, i32) {
    %c0_i32 = arith.constant 0 : i32
    %c0_i32_0 = arith.constant 0 : i32
    return %arg0, %c0_i32 : i32, i32
  }
  func.func @transform_1(%arg0: i32) -> (i32, i32) {
    %c0_i32 = arith.constant 0 : i32
    %c0_i32_0 = arith.constant 0 : i32
    %c0_i32_1 = arith.constant 0 : i32
    return %c0_i32, %c0_i32_0 : i32, i32
  }
  func.func @transform_2(%arg0: i32) -> (i32, i32) {
    %c0_i32 = arith.constant 0 : i32
    %c0_i32_0 = arith.constant 0 : i32
    %c0_i32_1 = arith.constant 0 : i32
    return %c0_i32, %c0_i32_0 : i32, i32
  }
  func.func @transform_3(%arg0: i32) -> (i32, i32) {
    %c0_i32 = arith.constant 0 : i32
    %c0_i32_0 = arith.constant 0 : i32
    return %arg0, %c0_i32 : i32, i32
  }
}

</mosaic_0001>

<bundles_post_ra>
// kernel: decoder_forward.1
= control target key start
LH: loop header
LB: loop body
LE: loop exit
PB: predicated region body
PF: predicated region fallthrough
CT: control target
= control target key end

     0   :  { %8 = vsyncpa [#allocation3], 0  ;;  %s887_s12 = smov 0   ;;  %s966_s0 = inlined_call_operand.vmem [shape: f32[64,8], index: 0, kind: input, shape index: {}]   ;;  %s967_s1 = inlined_call_operand.hbm [shape: f32[264,128], index: 1, kind: input, shape index: {}]   ;;  %s968_s2 = inlined_call_operand.vmem [shape: f32[8,128], index: 2, kind: input, shape index: {}]   ;;  %s969_s3 = inlined_call_operand.vmem [shape: f32[64,12], index: 3, kind: output, shape index: {}]  }
   0x1 LB: > { %s590_s13 = sadd.s32 4294967295, %s862_s12   ;;  %p592_p0 = scmp.ge.s32.totalorder %s862_s12, 1  ;;  %s862_s12 = sphi %s887_s12, %s14_s12  }
   0x2   : > { %p113_p1 = scmp.lt.s32.totalorder %s862_s12, 3  ;;  %s864_s14 = smov [#allocation2]  }
   0x3   : > { %s125_s15 = sshll.u32 %s864_s14, 4  ;;  %p901_p3 = scmp.eq.s32.totalorder %s590_s13, 0  ;;  %s126_s15 = int_to_ptr.vmem [resolvable:$true] %s125_s15 }
   0x4   : > { %p895_p2 = pnand %p592_p0, %p113_p1  ;;  %s824_s21 = scalar_lea.hbm %s967_s1, 4224 }
   0x5   : > { %s974_s17 = scalar_select %p901_p3, 1, 0 }
   0x6   : > { %s973_s16 = scalar_select %p895_p2, 1, 0 }
   0x7   : > { %p807_p4 = pneg %p895_p2  ;;  %p825_p6 = scmp.ne.s32.totalorder %s967_s1, %s824_s21 }
   0x8   : > { %p831_p10 = scmp.lt.u32.totalorder %s824_s21, %s967_s1 }
   0x9   : > { %p909_p5 = pnand %p901_p3, %p807_p4 }
   0xb   : > { %p826_p7 = pneg %p909_p5 }
   0xd   : > { %p827_p8 = pnand %p826_p7, %p825_p6 }
   0xf   : > { %p828_p9 = pneg %p827_p8 }
  0x11   : > { %p833_p11 = pnand %p831_p10, %p828_p9 }
  0x13   : > { %836 = shalt.err (!%p833_p11)
}
  0x14   : > { %s837_s26 = scalar_lea.vmem %s126_s15, 4224  ;;  %p845_p1 = scmp.lt.s32.totalorder %s126_s15, %s126_s15 }
  0x15   : > { %p838_p12 = scmp.ne.s32.totalorder %s126_s15, %s837_s26  ;;  %p846_p4 = scmp.lt.s32.totalorder %s837_s26, %s837_s26 }
  0x17   : > { %p840_p13 = pnand %p838_p12, %p826_p7  ;;  %p847_p3 = por %p846_p4, %p845_p1 }
  0x19   : > { %p841_p0 = pneg %p840_p13 }
  0x1b   : > { %p848_p2 = pnand %p847_p3, %p841_p0 }
  0x1d   : > { %851 = shalt.err (!%p848_p2)
}
  0x1e   : > { %s865_s27 = smov 128   ;;  %s866_s28 = smov 8  }
  0x1f   : > { %810 = dma.hbm_to_vmem [thread:$0]  (!%p909_p5), %s967_s1, 4224, %s126_s15, [#allocation3], %s865_s27, %s865_s27, %s866_s28  }
  0x20   : > { %p976_p6 = scmp.ne.s32.totalorder %s973_s16, 0 }
  0x21   : > { %p977_p8 = scmp.ne.s32.totalorder (!%p976_p6), %s974_s17, 0 }
  0x22   : > { %153 = sbr.rel (%p976_p6) target bundleno = 706 (0x2c2), region = 32 }
  0x29   : > { %857 = dma.done.wait (%p977_p8), [#allocation3], 4224  }
  0x2a   : > { %859 = vsyncadd (%p977_p8), [#allocation3], 4294963072  ;;  %s597_s4 = sshll.u32 %s590_s13, 2  ;;  %vm233_vm0 = vcmask 64512   ;;  %v193_v0 = vld [vmem:[#allocation2] sm:$0xff]  ;;  %v194_v4 = vld [vmem:[#allocation2 + $0x8] sm:$0xff] }
  0x2b   : > { %p178_p2 = scmp.lt.s32.totalorder %s597_s4, 7  ;;  %655 = vmatprep.subr.mxu0 %v193_v0  ;;  %v195_v5 = vld [vmem:[#allocation2 + $0x10] sm:$0xff]  ;;  %v196_v6 = vld [vmem:[#allocation2 + $0x18] sm:$0xff]  ;;  %v197_v7 = vld [vmem:[#allocation2 + $0x20] sm:$0xff]  ;;  %vm517_vm1 = vcmask 97280  }
  0x2c   : > { %656 = vmatpush3.msra.mxu0 %v193_v0  ;;  %v739_v8 = vpack.c.bf16 %v195_v5, %v194_v4  ;;  %v743_v9 = vpack.c.bf16 %v197_v7, %v196_v6  ;;  %v198_v11 = vld [vmem:[#allocation2 + $0x28] sm:$0xff]  ;;  %v199_v12 = vld [vmem:[#allocation2 + $0x30] sm:$0xff]  ;;  %v200_v14 = vld [vmem:[#allocation2 + $0x38] sm:$0xff] }
  0x2d   : > { %s979_s4 = smov (!%p178_p2, %s597_s4), 7  ;;  %v747_v13 = vpack.c.bf16 %v199_v12, %v198_v11  ;;  %v201_v15 = vld [vmem:[#allocation2 + $0x40] sm:$0xff]  ;;  %v202_v17 = vld [vmem:[#allocation2 + $0x48] sm:$0xff]  ;;  %v203_v18 = vld [vmem:[#allocation2 + $0x50] sm:$0xff] }
  0x2e   : > { %s598_s5 = sshll.u32 %s979_s4, 3  ;;  %740 = vmatprep.subr.bf16.mxu1 %v739_v8  ;;  %v751_v16 = vpack.c.bf16 %v201_v15, %v200_v14  ;;  %v755_v19 = vpack.c.bf16 %v203_v18, %v202_v17  ;;  %v204_v20 = vld [vmem:[#allocation2 + $0x58] sm:$0xff]  ;;  %v205_v21 = vld [vmem:[#allocation2 + $0x60] sm:$0xff]  ;;  %v206_v23 = vld [vmem:[#allocation2 + $0x68] sm:$0xff] }
  0x2f   : > { %s181_s8 = scalar_lea.vmem %s966_s0, %s598_s5  ;;  %742 = vmatpush3.bf16.msra.mxu1 %v739_v8  ;;  %v759_v22 = vpack.c.bf16 %v205_v21, %v204_v20  ;;  %v207_v24 = vld [vmem:[#allocation2 + $0x70] sm:$0xff]  ;;  %v208_v26 = vld [vmem:[#allocation2 + $0x78] sm:$0xff]  ;;  %v209_v27 = vld [vmem:[#allocation2 + $0x80] sm:$0xff]  ;;  %s187_s18 = scalar_lea.vmem %s969_s3, %s598_s5 }
  0x30   : > { %v189_v1 = vld [vmem:[%s181_s8] sm:$0xff]  ;;  %v190_v2 = vld [vmem:[%s181_s8 + $0x8] sm:$0xff]  ;;  %v191_v3 = vld [vmem:[%s181_s8 + $0x10] sm:$0xff]  ;;  %744 = vmatprep.subr.bf16.mxu1 %v743_v9  ;;  %v763_v25 = vpack.c.bf16 %v207_v24, %v206_v23  ;;  %v767_v28 = vpack.c.bf16 %v209_v27, %v208_v26 }
  0x31   : > { %657 = vmatprep.mubr.msk.f32.mxu0 %vm233_vm0, %v189_v1  ;;  %v192_v10 = vld [vmem:[%s181_s8 + $0x18] sm:$0xff]  ;;  %v210_v29 = vld [vmem:[#allocation2 + $0x88] sm:$0xff]  ;;  %v211_v30 = vld [vmem:[#allocation2 + $0x90] sm:$0xff] }
  0x32   : > { %658 = vmatmul.mubr.msk.f32.vlgmr.msra.gmra.mrb[0].mxu0 %vm233_vm0, %v190_v2  ;;  %v212_v31 = vld [vmem:[#allocation2 + $0x98] sm:$0xff]  ;;  %v771_v32 = vpack.c.bf16 %v211_v30, %v210_v29  ;;  %v213_v33 = vld [vmem:[#allocation2 + $0xa0] sm:$0xff]  ;;  %v214_v35 = vld [vmem:[#allocation2 + $0xa8] sm:$0xff] }
  0x33   : > { %660 = vmatprep.mubr.msk.f32.mxu0 %vm233_vm0, %v191_v3  ;;  %746 = vmatpush3.bf16.msra.mxu1 %v743_v9  ;;  %v775_v34 = vpack.c.bf16 %v213_v33, %v212_v31  ;;  %v215_v36 = vld [vmem:[#allocation2 + $0xb0] sm:$0xff]  ;;  %v216_v38 = vld [vmem:[#allocation2 + $0xb8] sm:$0xff]  ;;  %v217_v39 = vld [vmem:[#allocation2 + $0xc0] sm:$0xff] }
  0x34   : > { %748 = vmatprep.subr.bf16.mxu1 %v747_v13  ;;  %772 = vmatprep.subr.bf16.mxu0 %v771_v32  ;;  %v779_v37 = vpack.c.bf16 %v215_v36, %v214_v35  ;;  %v783_v40 = vpack.c.bf16 %v217_v39, %v216_v38  ;;  %v218_v41 = vld [vmem:[#allocation2 + $0xc8] sm:$0xff]  ;;  %v219_v42 = vld [vmem:[#allocation2 + $0xd0] sm:$0xff]  ;;  %v220_v44 = vld [vmem:[#allocation2 + $0xd8] sm:$0xff] }
  0x35   : > { %774 = vmatpush3.bf16.msra.mxu0 %v771_v32  ;;  %v787_v43 = vpack.c.bf16 %v219_v42, %v218_v41  ;;  %v221_v45 = vld [vmem:[#allocation2 + $0xe0] sm:$0xff]  ;;  %v222_v47 = vld [vmem:[#allocation2 + $0xe8] sm:$0xff]  ;;  %v223_v48 = vld [vmem:[#allocation2 + $0xf0] sm:$0xff] }
  0x36   : > { %661 = vmatmul.mubr.msk.f32.gmra.mrb[2].mxu0 %vm233_vm0, %v192_v10  ;;  %776 = vmatprep.subr.bf16.mxu0 %v775_v34  ;;  %v791_v46 = vpack.c.bf16 %v221_v45, %v220_v44  ;;  %v795_v49 = vpack.c.bf16 %v223_v48, %v222_v47  ;;  %v601_v50 = vld [vmem:[%s968_s2] ss:$0 sm:$0xff]  ;;  %v224_v63 = vld [vmem:[#allocation2 + $0xf8] sm:$0xff]  ;;  %v606_v2 = vld [vmem:[%s968_s2 + $0x1] ss:$0 sm:$0xff] }
  0x37   : > { %750 = vmatpush3.bf16.msra.mxu1 %v747_v13  ;;  %v225_v0 = vld [vmem:[#allocation2 + $0x100] sm:$0xff] }
  0x38   : > { %752 = vmatprep.subr.bf16.mxu1 %v751_v16  ;;  %v799_v1 = vpack.c.bf16 %v225_v0, %v224_v63  ;;  %v607_v15 = vld [vmem:[%s968_s2 + $0x2] ss:$0 sm:$0xff] }
  0x39   : > { %778 = vmatpush3.bf16.msra.mxu0 %v775_v34 }
  0x3a   : > { %780 = vmatprep.subr.bf16.mxu0 %v779_v37 }
  0x3b   : > { %754 = vmatpush3.bf16.msra.mxu1 %v751_v16 }
  0x3c   : > { %756 = vmatprep.subr.bf16.mxu1 %v755_v19 }
  0x3d   : > { %782 = vmatpush3.bf16.msra.mxu0 %v779_v37 }
  0x3e   : > { %784 = vmatprep.subr.bf16.mxu0 %v783_v40 }
  0x3f   : > { %758 = vmatpush3.bf16.msra.mxu1 %v755_v19 }
  0x40   : > { %760 = vmatprep.subr.bf16.mxu1 %v759_v22 }
  0x41   : > { %786 = vmatpush3.bf16.msra.mxu0 %v783_v40 }
  0x42   : > { %788 = vmatprep.subr.bf16.mxu0 %v787_v43 }
  0x43   : > { %762 = vmatpush3.bf16.msra.mxu1 %v759_v22 }
  0x44   : > { %764 = vmatprep.subr.bf16.mxu1 %v763_v25 }
  0x45   : > { %790 = vmatpush3.bf16.msra.mxu0 %v787_v43 }
  0x46   : > { %792 = vmatprep.subr.bf16.mxu0 %v791_v46 }
  0x47   : > { %766 = vmatpush3.bf16.msra.mxu1 %v763_v25 }
  0x48   : > { %768 = vmatprep.subr.bf16.mxu1 %v767_v28 }
  0x49   : > { %794 = vmatpush3.bf16.msra.mxu0 %v791_v46 }
  0x4a   : > { %796 = vmatprep.subr.bf16.mxu0 %v795_v49 }
  0x4b   : > { %770 = vmatpush3.bf16.msra.mxu1 %v767_v28 }
  0x4d   : > { %798 = vmatpush3.bf16.msra.mxu0 %v795_v49 }
  0x4e   : > { %800 = vmatprep.subr.bf16.mxu0 %v799_v1 }
  0x51   : > { %802 = vmatpush3.bf16.msra.mxu0 %v799_v1 }
 0x105   : > { %v659_v51 = vpop.f32.mrb[0].mxu0 }
 0x106   : > { %v318_v52 = vadd.f32 %v659_v51, %v601_v50  ;;  %v312_v53 = vpop.f32.mrb[1].mxu0 }
 0x107   : > { %v313_v54 = vadd.f32 %v601_v50, %v312_v53 }
 0x108   : > { %v332_v57 = vmax.f32 %v318_v52, 0.0 }
 0x109   : > { %v662_v55 = vpop.f32.mrb[2].mxu0  ;;  %v331_v56 = vmax.f32 %v313_v54, 0.0 }
 0x10a   : > { %v328_v58 = vadd.f32 %v662_v55, %v601_v50  ;;  %v322_v59 = vpop.f32.mrb[3].mxu0 }
 0x10b   : > { %v323_v60 = vadd.f32 %v601_v50, %v322_v59  ;;  %695 = vmatprep.mubr.f32.mxu1 %v331_v56 }
 0x10c   : > { %696 = vmatmul.mubr.f32.vlgmr.msra.gmra.mrb[0].mxu1 %v332_v57  ;;  %v334_v62 = vmax.f32 %v328_v58, 0.0 }
 0x10d   : > { %v333_v61 = vmax.f32 %v323_v60, 0.0 }
 0x10f   : > { %698 = vmatprep.mubr.f32.mxu1 %v333_v61 }
 0x110   : > { %699 = vmatmul.mubr.f32.gmra.mrb[2].mxu1 %v334_v62 }
 0x1df   : > { %v697_v3 = vpop.f32.mrb[0].mxu1 }
 0x1e0   : > { %v411_v4 = vadd.f32 %v697_v3, %v606_v2  ;;  %v405_v5 = vpop.f32.mrb[1].mxu1 }
 0x1e1   : > { %v406_v6 = vadd.f32 %v606_v2, %v405_v5 }
 0x1e2   : > { %v425_v9 = vmax.f32 %v411_v4, 0.0 }
 0x1e3   : > { %v424_v7 = vmax.f32 %v406_v6, 0.0  ;;  %v700_v8 = vpop.f32.mrb[2].mxu1 }
 0x1e4   : > { %v421_v10 = vadd.f32 %v700_v8, %v606_v2  ;;  %v415_v11 = vpop.f32.mrb[3].mxu1 }
 0x1e5   : > { %v416_v12 = vadd.f32 %v606_v2, %v415_v11  ;;  %733 = vmatprep.mubr.f32.mxu0 %v424_v7 }
 0x1e6   : > { %734 = vmatmul.mubr.f32.vlgmr.msra.gmra.mrb[4].mxu0 %v425_v9  ;;  %v427_v14 = vmax.f32 %v421_v10, 0.0 }
 0x1e7   : > { %v426_v13 = vmax.f32 %v416_v12, 0.0 }
 0x1e9   : > { %736 = vmatprep.mubr.f32.mxu0 %v426_v13 }
 0x1ea   : > { %737 = vmatmul.mubr.f32.gmra.mrb[6].mxu0 %v427_v14 }
 0x2b9   : > { %v735_v16 = vpop.f32.mrb[4].mxu0 }
 0x2ba   : > { %v498_v17 = vpop.f32.mrb[5].mxu0  ;;  %v504_v19 = vadd.f32 %v735_v16, %v607_v15 }
 0x2bb   : > { %v499_v18 = vadd.f32 %v607_v15, %v498_v17 }
 0x2bc   : > { %519 = vst.msk [vmem:[%s187_s18 + $0x8] sm:$0xff] %vm517_vm1, %v504_v19 }
 0x2bd   : > { %518 = vst.msk [vmem:[%s187_s18] sm:$0xff] %vm517_vm1, %v499_v18  ;;  %v738_v20 = vpop.f32.mrb[6].mxu0 }
 0x2be   : > { %v508_v21 = vpop.f32.mrb[7].mxu0  ;;  %v514_v23 = vadd.f32 %v738_v20, %v607_v15 }
 0x2bf   : > { %v509_v22 = vadd.f32 %v607_v15, %v508_v21 }
 0x2c0   : > { %521 = vst.msk [vmem:[%s187_s18 + $0x18] sm:$0xff] %vm517_vm1, %v514_v23 }
 0x2c1   : > { %520 = vst.msk [vmem:[%s187_s18 + $0x10] sm:$0xff] %vm517_vm1, %v509_v22 }
 0x2c2 PF: > { %s14_s12 = sadd.s32 1, %s862_s12  }
 0x2c3   : > { %p11_p3 = scmp.ge.s32.totalorder %s14_s12, 4  }
 0x2c5   :  { %13 = sbr.rel (!%p11_p3) target bundleno = 1 (0x1), region = 67 }
 0x2cc   :  { %544 = vsyncpa [#allocation3], 1 }
 0x2cd   :  { %546 = vsyncpa [#allocation3 + $0x1], 1 }

</bundles_post_ra>
